<compile_context>
chip_gen: v5e
topology: v5e:2x2
jax: 0.10.0
libtpu: 0.0.40
codegen_flags: <defaults>
</compile_context>

<pallas_src>
import jax
import jax.numpy as jnp
from jax.experimental import pallas as pl
from jax.experimental.pallas import tpu as pltpu


def _make_kernel(ew_dtype):
    """Build the kernel with the elementwise compute dtype baked in."""

    def cnn1d_kernel(x_ref, w1_ref, s1_ref, t1_ref, w2_ref, s2_ref, t2_ref,
                     wf_ref, bf_ref, out_ref):
        TB, L, C = x_ref.shape          # batch block, seq len, padded channels
        M = TB * L                      # MXU rows per grid step

        # (M, 1) per-row "position within sequence" masks. jnp.where broadcasts
        # them across the 128 lanes, so the integer iota/compare is per-row
        # only (not blown up to full lane width).
        l_idx = jax.lax.broadcasted_iota(jnp.int32, (TB, L, 1), 1).reshape(M, 1)
        not_first = l_idx != 0          # rows that may take the x[l-1] tap
        not_last = l_idx != (L - 1)     # rows that may take the x[l+1] tap

        def conv_bn_relu(h_in, w_ref, s_ref, t_ref, out_dtype):
            # One MXU matmul covers all 3 taps: (M, C) @ (C, 3C), f32 acc.
            p = jnp.dot(h_in, w_ref[...], preferred_element_type=jnp.float32)
            p0 = p[:, 0 * C:1 * C]      # tap k=0: x[r] contributes to y[r+1]
            p1 = p[:, 1 * C:2 * C]      # tap k=1: x[r] contributes to y[r]
            p2 = p[:, 2 * C:3 * C]      # tap k=2: x[r] contributes to y[r-1]
            # Shift the matmul OUTPUTS along the sublane axis (XLU slot,
            # otherwise idle) and mask the sequence boundaries; rows that wrap
            # across sample boundaries land exactly on the masked rows, so no
            # cross-sample leakage. The 3-tap sum stays f32.
            y = (jnp.where(not_first, pltpu.roll(p0, shift=1, axis=0), 0.0)
                 + p1
                 + jnp.where(not_last, pltpu.roll(p2, shift=M - 1, axis=0), 0.0))
            # Folded (conv-bias + eval-mode BN) scale/shift + ReLU in ew_dtype
            # (bf16 on v6e/v7x, f32 on v5e).
            h = jnp.maximum(
                y.astype(ew_dtype) * s_ref[...].astype(ew_dtype)
                + t_ref[...].astype(ew_dtype), 0.0)
            return h.astype(out_dtype)

        x = x_ref[...].reshape(M, C)                              # bf16
        h1 = conv_bn_relu(x, w1_ref, s1_ref, t1_ref, jnp.bfloat16)
        h2 = conv_bn_relu(h1, w2_ref, s2_ref, t2_ref, jnp.float32)

        # Fused AdaptiveAvgPool1d(1) + Linear(n_filt, 1), f32 reductions:
        #   out[b] = (1/L) * sum_{l,c} h2[b,l,c] * wf[c] + bf
        pooled = jnp.sum(h2.reshape(TB, L, C), axis=1) * (1.0 / L)   # (TB, C)
        res = jnp.sum(pooled * wf_ref[...], axis=1) + bf_ref[0]      # (TB,)
        out_ref[...] = res.reshape(1, 1, TB)

    return cnn1d_kernel


def _pick_batch_block(B, L, target_rows=2048, max_rows=4096):
    """Rows per grid step ~target_rows (amortizes the ~0.35us per-step pipeline
    overhead), capped by the VMEM budget (max_rows of live f32 intermediates)
    and by grid >= 2 whenever B >= 2 (keeps both v7x TensorCores busy and the
    HBM->VMEM pipeline active). The batch is padded to a multiple of TB by the
    wrapper, so TB need not divide B."""
    if B <= 1:
        return 1
    rows_cap = max(1, min(target_rows, max_rows) // max(L, 1))
    return max(1, min(rows_cap, (B + 1) // 2))


def _vmem_limit_bytes(TB, L, C):
    """Scoped-VMEM request sized from the actual working set, with headroom.
    Capped at 64 MiB so it never exceeds v7x physical VMEM."""
    M = TB * L
    x_bytes = 2 * M * C * 2                    # double-buffered bf16 x block
    w_bytes = 2 * 2 * C * (3 * C) * 2          # two (C,3C) bf16 weights, dbl-buffered
    inter_bytes = 8 * M * C * 4                # ~8 live f32 (M,C) temporaries
    total = x_bytes + w_bytes + inter_bytes + (4 << 20)
    return int(min(64 << 20, max(32 << 20, 2 * total)))


def _elementwise_dtype():
    """bf16 elementwise on chips with bf16-capable VPUs (v6e/v7x); f32 on v5e
    and older / unknown backends."""
    try:
        kind = jax.devices()[0].device_kind.lower()
    except Exception:
        return jnp.float32
    if any(tag in kind for tag in ("v6", "v7", "tpu7")):
        return jnp.bfloat16
    return jnp.float32


def cnn1d_forward(x, kp):
    """x: (B, L, n_feat) float32 -> (B,) float32."""
    B, L, n_feat = x.shape
    C = kp['w1'].shape[0]                       # padded channel width (128)

    TB = _pick_batch_block(B, L)
    num_blocks = -(-B // TB)                    # ceil(B / TB)
    B_pad = num_blocks * TB

    # Zero-pad channels to the 128-lane width and the batch to a multiple of
    # TB; cast the matmul operand to bf16 (accumulation stays f32 on the MXU).
    xp = jnp.pad(x, ((0, B_pad - B), (0, 0), (0, C - n_feat))).astype(jnp.bfloat16)

    full2 = lambda i: (0, 0)
    out = pl.pallas_call(
        _make_kernel(_elementwise_dtype()),
        grid=(num_blocks,),
        in_specs=[
            pl.BlockSpec((TB, L, C), lambda i: (i, 0, 0)),      # x block
            pl.BlockSpec((C, 3 * C), full2),                    # w1 (3 taps fused)
            pl.BlockSpec((1, C), full2),                        # s1
            pl.BlockSpec((1, C), full2),                        # t1 (conv bias folded)
            pl.BlockSpec((C, 3 * C), full2),                    # w2 (3 taps fused)
            pl.BlockSpec((1, C), full2),                        # s2
            pl.BlockSpec((1, C), full2),                        # t2
            pl.BlockSpec((1, C), full2),                        # wf
            pl.BlockSpec(memory_space=pltpu.MemorySpace.SMEM),  # bf scalar
        ],
        # Lane-dense output: last block dim == full array dim (no TB%8 rule).
        out_specs=pl.BlockSpec((1, 1, TB), lambda i: (i, 0, 0)),
        out_shape=jax.ShapeDtypeStruct((num_blocks, 1, TB), jnp.float32),
        compiler_params=pltpu.CompilerParams(
            dimension_semantics=("parallel",),
            vmem_limit_bytes=_vmem_limit_bytes(TB, L, C)),
    )(xp, kp['w1'], kp['s1'], kp['t1'], kp['w2'], kp['s2'], kp['t2'],
      kp['wf'], kp['bf'])
    return out.reshape(B_pad)[:B]


def init_params(key, n_feat, n_filt, eps=1e-5):
    """Raw (unpadded, f32) parameters of the PyTorch module, eval-mode BN."""
    ks = jax.random.split(key, 14)
    w1 = 0.1 * jax.random.normal(ks[0], (3, n_feat, n_filt), jnp.float32)
    b1 = 0.1 * jax.random.normal(ks[1], (n_filt,), jnp.float32)
    w2 = 0.1 * jax.random.normal(ks[2], (3, n_filt, n_filt), jnp.float32)
    b2 = 0.1 * jax.random.normal(ks[3], (n_filt,), jnp.float32)

    g1 = 1.0 + 0.1 * jax.random.normal(ks[4], (n_filt,), jnp.float32)
    be1 = 0.1 * jax.random.normal(ks[5], (n_filt,), jnp.float32)
    rm1 = 0.1 * jax.random.normal(ks[6], (n_filt,), jnp.float32)
    rv1 = 1.0 + 0.1 * jax.random.uniform(ks[7], (n_filt,), jnp.float32)
    g2 = 1.0 + 0.1 * jax.random.normal(ks[8], (n_filt,), jnp.float32)
    be2 = 0.1 * jax.random.normal(ks[9], (n_filt,), jnp.float32)
    rm2 = 0.1 * jax.random.normal(ks[10], (n_filt,), jnp.float32)
    rv2 = 1.0 + 0.1 * jax.random.uniform(ks[11], (n_filt,), jnp.float32)

    # Fold BN (eval) into per-channel scale/shift: y = h*s + t
    s1 = g1 / jnp.sqrt(rv1 + eps); t1 = be1 - rm1 * s1
    s2 = g2 / jnp.sqrt(rv2 + eps); t2 = be2 - rm2 * s2

    wf = 0.1 * jax.random.normal(ks[12], (n_filt, 1), jnp.float32)
    bf = 0.1 * jax.random.normal(ks[13], (1,), jnp.float32)
    return dict(w1=w1, b1=b1, s1=s1, t1=t1, w2=w2, b2=b2, s2=s2, t2=t2,
                wf=wf, bf=bf)


def prepare_params(raw, lane=128):
    """Kernel-side parameter prep: fold conv bias into the BN shift, zero-pad
    channels to a multiple of 128, fuse the 3 conv taps along N, and cast the
    matmul weights to bf16 (per-channel scale/shift stay f32)."""
    n_feat, n_filt = raw['w1'].shape[1], raw['w1'].shape[2]
    C = lane * ((max(n_feat, n_filt) + lane - 1) // lane)

    def pad_taps(w):                    # (3, cin, cout) -> (C, 3*C) bf16
        w3 = jnp.zeros((3, C, C), jnp.float32)
        w3 = w3.at[:, :w.shape[1], :w.shape[2]].set(w)
        return jnp.concatenate([w3[0], w3[1], w3[2]], axis=1).astype(jnp.bfloat16)

    def pad_vec(v):                     # (n,) -> (1, C) f32
        return jnp.pad(v, (0, C - v.shape[0])).reshape(1, C)

    # (acc + conv_bias) * s + t  ==  acc * s + (conv_bias * s + t)
    t1 = raw['b1'] * raw['s1'] + raw['t1']
    t2 = raw['b2'] * raw['s2'] + raw['t2']
    return dict(
        w1=pad_taps(raw['w1']), s1=pad_vec(raw['s1']), t1=pad_vec(t1),
        w2=pad_taps(raw['w2']), s2=pad_vec(raw['s2']), t2=pad_vec(t2),
        wf=pad_vec(raw['wf'][:, 0]), bf=raw['bf'].reshape(1),
    )


def reference_forward(x, raw):
    """Pure-JAX f32 reference of the same forward math (for verification)."""
    B, L, _ = x.shape
    xp = jnp.pad(x, ((0, 0), (1, 1), (0, 0)))
    h1 = sum(jnp.einsum('bli,io->blo', xp[:, k:k + L, :], raw['w1'][k])
             for k in range(3)) + raw['b1']
    h1 = jnp.maximum(h1 * raw['s1'] + raw['t1'], 0.0)
    h1p = jnp.pad(h1, ((0, 0), (1, 1), (0, 0)))
    h2 = sum(jnp.einsum('bli,io->blo', h1p[:, k:k + L, :], raw['w2'][k])
             for k in range(3)) + raw['b2']
    h2 = jnp.maximum(h2 * raw['s2'] + raw['t2'], 0.0)
    pooled = jnp.mean(h2, axis=1)
    return (pooled @ raw['wf'])[:, 0] + raw['bf'][0]


if __name__ == "__main__":
    B, L, n_feat, n_filt = 4, 16, 77, 96   # module defaults: n_feat=77, n_filt=96

    key = jax.random.PRNGKey(0)
    kx, kp_key = jax.random.split(key)
    x = jax.random.normal(kx, (B, L, n_feat), jnp.float32)
    raw = init_params(kp_key, n_feat, n_filt)
    kparams = prepare_params(raw)

    out = jax.block_until_ready(cnn1d_forward(x, kparams))
    ref = jax.block_until_ready(reference_forward(x, raw))

    assert out.shape == (B,), out.shape
    # bf16 matmul operands / bf16 elementwise on v6e+ -> loose tolerance vs f32 ref
    assert jnp.allclose(out, ref, rtol=5e-2, atol=5e-2), (out, ref)
    print("KERNEL_OK")
</pallas_src>

<mosaic_0001>
module attributes {stable_mosaic.version = 11 : i64} {
  func.func @cnn1d_kernel(%arg0: i32, %arg1: memref<2x16x128xbf16, #tpu.memory_space<vmem>>, %arg2: memref<128x384xbf16, #tpu.memory_space<vmem>>, %arg3: memref<1x128xf32, #tpu.memory_space<vmem>>, %arg4: memref<1x128xf32, #tpu.memory_space<vmem>>, %arg5: memref<128x384xbf16, #tpu.memory_space<vmem>>, %arg6: memref<1x128xf32, #tpu.memory_space<vmem>>, %arg7: memref<1x128xf32, #tpu.memory_space<vmem>>, %arg8: memref<1x128xf32, #tpu.memory_space<vmem>>, %arg9: memref<1xf32, #tpu.memory_space<smem>>, %arg10: memref<1x1x2xf32, #tpu.memory_space<vmem>>) attributes {dimension_semantics = [#tpu.dimension_semantics<parallel>], iteration_bounds = array<i64: 2>, scalar_prefetch = 0 : i64, scratch_operands = 0 : i64, tpu.core_type = #tpu.core_type<tc>, window_params = [{transform_indices = @transform_0, window_bounds = array<i64: 2, 16, 128>}, {pipeline_mode = #tpu.pipeline_mode<synchronous>, transform_indices = @transform_1, window_bounds = array<i64: 128, 384>}, {pipeline_mode = #tpu.pipeline_mode<synchronous>, transform_indices = @transform_2, window_bounds = array<i64: 1, 128>}, {pipeline_mode = #tpu.pipeline_mode<synchronous>, transform_indices = @transform_3, window_bounds = array<i64: 1, 128>}, {pipeline_mode = #tpu.pipeline_mode<synchronous>, transform_indices = @transform_4, window_bounds = array<i64: 128, 384>}, {pipeline_mode = #tpu.pipeline_mode<synchronous>, transform_indices = @transform_5, window_bounds = array<i64: 1, 128>}, {pipeline_mode = #tpu.pipeline_mode<synchronous>, transform_indices = @transform_6, window_bounds = array<i64: 1, 128>}, {pipeline_mode = #tpu.pipeline_mode<synchronous>, transform_indices = @transform_7, window_bounds = array<i64: 1, 128>}, {transform_indices = @transform_8, window_bounds = array<i64: 1>}, {transform_indices = @transform_9, window_bounds = array<i64: 1, 1, 2>}]} {
    %0 = tpu.iota {dimensions = array<i32: 1>} : vector<2x16x1xi32>
    %1 = vector.shape_cast %0 : vector<2x16x1xi32> to vector<32x1xi32>
    %c0_i32 = arith.constant 0 : i32
    %2 = vector.broadcast %c0_i32 : i32 to vector<32x1xi32>
    %3 = arith.cmpi ne, %1, %2 : vector<32x1xi32>
    %c15_i32 = arith.constant 15 : i32
    %4 = vector.broadcast %c15_i32 : i32 to vector<32x1xi32>
    %5 = arith.cmpi ne, %1, %4 : vector<32x1xi32>
    %c0 = arith.constant 0 : index
    %c0_0 = arith.constant 0 : index
    %c0_1 = arith.constant 0 : index
    %6 = vector.load %arg1[%c0, %c0_0, %c0_1] : memref<2x16x128xbf16, #tpu.memory_space<vmem>>, vector<2x16x128xbf16>
    %7 = vector.shape_cast %6 : vector<2x16x128xbf16> to vector<32x128xbf16>
    %c0_2 = arith.constant 0 : index
    %c0_3 = arith.constant 0 : index
    %8 = vector.load %arg2[%c0_2, %c0_3] : memref<128x384xbf16, #tpu.memory_space<vmem>>, vector<128x384xbf16>
    %cst = arith.constant dense<0.000000e+00> : vector<32x384xf32>
    %9 = tpu.matmul %7, %8, %cst {dimension_numbers = #tpu.dot_dimension_numbers<[1], [0], [0], [1], [0, 0, 1, 1], [], []>} : vector<32x128xbf16>, vector<128x384xbf16>, vector<32x384xf32> -> vector<32x384xf32>
    %10 = vector.extract_strided_slice %9 {offsets = [0, 0], sizes = [32, 128], strides = [1, 1]} : vector<32x384xf32> to vector<32x128xf32>
    %11 = vector.extract_strided_slice %9 {offsets = [0, 128], sizes = [32, 128], strides = [1, 1]} : vector<32x384xf32> to vector<32x128xf32>
    %12 = vector.extract_strided_slice %9 {offsets = [0, 256], sizes = [32, 128], strides = [1, 1]} : vector<32x384xf32> to vector<32x128xf32>
    %c1_i32 = arith.constant 1 : i32
    %13 = tpu.dynamic_rotate %10 by %c1_i32 dim 0 : vector<32x128xf32>, i32 -> vector<32x128xf32>
    %cst_4 = arith.constant 0.000000e+00 : f32
    %14 = vector.shape_cast %3 : vector<32x1xi1> to vector<32x1xi1>
    %15 = vector.broadcast %14 : vector<32x1xi1> to vector<32x128xi1>
    %16 = vector.broadcast %cst_4 : f32 to vector<32x128xf32>
    %17 = arith.select %15, %13, %16 : vector<32x128xi1>, vector<32x128xf32>
    %18 = arith.addf %17, %11 : vector<32x128xf32>
    %c31_i32 = arith.constant 31 : i32
    %19 = tpu.dynamic_rotate %12 by %c31_i32 dim 0 : vector<32x128xf32>, i32 -> vector<32x128xf32>
    %cst_5 = arith.constant 0.000000e+00 : f32
    %20 = vector.shape_cast %5 : vector<32x1xi1> to vector<32x1xi1>
    %21 = vector.broadcast %20 : vector<32x1xi1> to vector<32x128xi1>
    %22 = vector.broadcast %cst_5 : f32 to vector<32x128xf32>
    %23 = arith.select %21, %19, %22 : vector<32x128xi1>, vector<32x128xf32>
    %24 = arith.addf %18, %23 : vector<32x128xf32>
    %c0_6 = arith.constant 0 : index
    %c0_7 = arith.constant 0 : index
    %25 = vector.load %arg3[%c0_6, %c0_7] : memref<1x128xf32, #tpu.memory_space<vmem>>, vector<1x128xf32>
    %26 = vector.broadcast %25 : vector<1x128xf32> to vector<32x128xf32>
    %27 = arith.mulf %24, %26 : vector<32x128xf32>
    %c0_8 = arith.constant 0 : index
    %c0_9 = arith.constant 0 : index
    %28 = vector.load %arg4[%c0_8, %c0_9] : memref<1x128xf32, #tpu.memory_space<vmem>>, vector<1x128xf32>
    %29 = vector.broadcast %28 : vector<1x128xf32> to vector<32x128xf32>
    %30 = arith.addf %27, %29 : vector<32x128xf32>
    %cst_10 = arith.constant 0.000000e+00 : f32
    %31 = vector.broadcast %cst_10 : f32 to vector<32x128xf32>
    %32 = arith.maximumf %30, %31 : vector<32x128xf32>
    %33 = arith.truncf %32 : vector<32x128xf32> to vector<32x128xbf16>
    %c0_11 = arith.constant 0 : index
    %c0_12 = arith.constant 0 : index
    %34 = vector.load %arg5[%c0_11, %c0_12] : memref<128x384xbf16, #tpu.memory_space<vmem>>, vector<128x384xbf16>
    %cst_13 = arith.constant dense<0.000000e+00> : vector<32x384xf32>
    %35 = tpu.matmul %33, %34, %cst_13 {dimension_numbers = #tpu.dot_dimension_numbers<[1], [0], [0], [1], [0, 0, 1, 1], [], []>} : vector<32x128xbf16>, vector<128x384xbf16>, vector<32x384xf32> -> vector<32x384xf32>
    %36 = vector.extract_strided_slice %35 {offsets = [0, 0], sizes = [32, 128], strides = [1, 1]} : vector<32x384xf32> to vector<32x128xf32>
    %37 = vector.extract_strided_slice %35 {offsets = [0, 128], sizes = [32, 128], strides = [1, 1]} : vector<32x384xf32> to vector<32x128xf32>
    %38 = vector.extract_strided_slice %35 {offsets = [0, 256], sizes = [32, 128], strides = [1, 1]} : vector<32x384xf32> to vector<32x128xf32>
    %c1_i32_14 = arith.constant 1 : i32
    %39 = tpu.dynamic_rotate %36 by %c1_i32_14 dim 0 : vector<32x128xf32>, i32 -> vector<32x128xf32>
    %cst_15 = arith.constant 0.000000e+00 : f32
    %40 = vector.shape_cast %3 : vector<32x1xi1> to vector<32x1xi1>
    %41 = vector.broadcast %40 : vector<32x1xi1> to vector<32x128xi1>
    %42 = vector.broadcast %cst_15 : f32 to vector<32x128xf32>
    %43 = arith.select %41, %39, %42 : vector<32x128xi1>, vector<32x128xf32>
    %44 = arith.addf %43, %37 : vector<32x128xf32>
    %c31_i32_16 = arith.constant 31 : i32
    %45 = tpu.dynamic_rotate %38 by %c31_i32_16 dim 0 : vector<32x128xf32>, i32 -> vector<32x128xf32>
    %cst_17 = arith.constant 0.000000e+00 : f32
    %46 = vector.shape_cast %5 : vector<32x1xi1> to vector<32x1xi1>
    %47 = vector.broadcast %46 : vector<32x1xi1> to vector<32x128xi1>
    %48 = vector.broadcast %cst_17 : f32 to vector<32x128xf32>
    %49 = arith.select %47, %45, %48 : vector<32x128xi1>, vector<32x128xf32>
    %50 = arith.addf %44, %49 : vector<32x128xf32>
    %c0_18 = arith.constant 0 : index
    %c0_19 = arith.constant 0 : index
    %51 = vector.load %arg6[%c0_18, %c0_19] : memref<1x128xf32, #tpu.memory_space<vmem>>, vector<1x128xf32>
    %52 = vector.broadcast %51 : vector<1x128xf32> to vector<32x128xf32>
    %53 = arith.mulf %50, %52 : vector<32x128xf32>
    %c0_20 = arith.constant 0 : index
    %c0_21 = arith.constant 0 : index
    %54 = vector.load %arg7[%c0_20, %c0_21] : memref<1x128xf32, #tpu.memory_space<vmem>>, vector<1x128xf32>
    %55 = vector.broadcast %54 : vector<1x128xf32> to vector<32x128xf32>
    %56 = arith.addf %53, %55 : vector<32x128xf32>
    %cst_22 = arith.constant 0.000000e+00 : f32
    %57 = vector.broadcast %cst_22 : f32 to vector<32x128xf32>
    %58 = arith.maximumf %56, %57 : vector<32x128xf32>
    %59 = vector.shape_cast %58 : vector<32x128xf32> to vector<2x16x128xf32>
    %cst_23 = arith.constant dense<0.000000e+00> : vector<2x128xf32>
    %60 = vector.multi_reduction <add>, %59, %cst_23 [1] : vector<2x16x128xf32> to vector<2x128xf32>
    %cst_24 = arith.constant 6.250000e-02 : f32
    %61 = vector.broadcast %cst_24 : f32 to vector<2x128xf32>
    %62 = arith.mulf %60, %61 : vector<2x128xf32>
    %c0_25 = arith.constant 0 : index
    %c0_26 = arith.constant 0 : index
    %63 = vector.load %arg8[%c0_25, %c0_26] : memref<1x128xf32, #tpu.memory_space<vmem>>, vector<1x128xf32>
    %64 = vector.broadcast %63 : vector<1x128xf32> to vector<2x128xf32>
    %65 = arith.mulf %62, %64 : vector<2x128xf32>
    %cst_27 = arith.constant dense<0.000000e+00> : vector<2xf32>
    %66 = vector.multi_reduction <add>, %65, %cst_27 [1] : vector<2x128xf32> to vector<2xf32>
    %c0_28 = arith.constant 0 : index
    %67 = memref.load %arg9[%c0_28] : memref<1xf32, #tpu.memory_space<smem>>
    %68 = vector.broadcast %67 : f32 to vector<2xf32>
    %69 = arith.addf %66, %68 : vector<2xf32>
    %70 = vector.shape_cast %69 : vector<2xf32> to vector<1x1x2xf32>
    %c0_29 = arith.constant 0 : index
    %c0_30 = arith.constant 0 : index
    %c0_31 = arith.constant 0 : index
    %71 = vector.load %arg10[%c0_29, %c0_30, %c0_31] : memref<1x1x2xf32, #tpu.memory_space<vmem>>, vector<1x1x2xf32>
    tpu.vector_store %arg10[%c0_29, %c0_30, %c0_31], %70 {strides = array<i32>} : memref<1x1x2xf32, #tpu.memory_space<vmem>>, vector<1x1x2xf32>,
    return
  }
  func.func @transform_0(%arg0: i32) -> (i32, i32, i32) {
    %c0_i32 = arith.constant 0 : i32
    %c0_i32_0 = arith.constant 0 : i32
    %c0_i32_1 = arith.constant 0 : i32
    return %arg0, %c0_i32, %c0_i32_0 : i32, i32, i32
  }
  func.func @transform_1(%arg0: i32) -> (i32, i32) {
    %c0_i32 = arith.constant 0 : i32
    %c0_i32_0 = arith.constant 0 : i32
    %c0_i32_1 = arith.constant 0 : i32
    return %c0_i32, %c0_i32_0 : i32, i32
  }
  func.func @transform_2(%arg0: i32) -> (i32, i32) {
    %c0_i32 = arith.constant 0 : i32
    %c0_i32_0 = arith.constant 0 : i32
    %c0_i32_1 = arith.constant 0 : i32
    return %c0_i32, %c0_i32_0 : i32, i32
  }
  func.func @transform_3(%arg0: i32) -> (i32, i32) {
    %c0_i32 = arith.constant 0 : i32
    %c0_i32_0 = arith.constant 0 : i32
    %c0_i32_1 = arith.constant 0 : i32
    return %c0_i32, %c0_i32_0 : i32, i32
  }
  func.func @transform_4(%arg0: i32) -> (i32, i32) {
    %c0_i32 = arith.constant 0 : i32
    %c0_i32_0 = arith.constant 0 : i32
    %c0_i32_1 = arith.constant 0 : i32
    return %c0_i32, %c0_i32_0 : i32, i32
  }
  func.func @transform_5(%arg0: i32) -> (i32, i32) {
    %c0_i32 = arith.constant 0 : i32
    %c0_i32_0 = arith.constant 0 : i32
    %c0_i32_1 = arith.constant 0 : i32
    return %c0_i32, %c0_i32_0 : i32, i32
  }
  func.func @transform_6(%arg0: i32) -> (i32, i32) {
    %c0_i32 = arith.constant 0 : i32
    %c0_i32_0 = arith.constant 0 : i32
    %c0_i32_1 = arith.constant 0 : i32
    return %c0_i32, %c0_i32_0 : i32, i32
  }
  func.func @transform_7(%arg0: i32) -> (i32, i32) {
    %c0_i32 = arith.constant 0 : i32
    %c0_i32_0 = arith.constant 0 : i32
    %c0_i32_1 = arith.constant 0 : i32
    return %c0_i32, %c0_i32_0 : i32, i32
  }
  func.func @transform_8(%arg0: i32) -> i32 {
    %c0_i32 = arith.constant 0 : i32
    %c0_i32_0 = arith.constant 0 : i32
    return %c0_i32 : i32
  }
  func.func @transform_9(%arg0: i32) -> (i32, i32, i32) {
    %c0_i32 = arith.constant 0 : i32
    %c0_i32_0 = arith.constant 0 : i32
    %c0_i32_1 = arith.constant 0 : i32
    return %arg0, %c0_i32, %c0_i32_0 : i32, i32, i32
  }
}

</mosaic_0001>

<bundles_post_ra>
// kernel: tpu_custom_call.1
= control target key start
LH: loop header
LB: loop body
LE: loop exit
PB: predicated region body
PF: predicated region fallthrough
CT: control target
= control target key end

     0   :  { %s1939_s0 = inlined_call_operand.hbm [shape: bf16[4,16,128], index: 0, kind: input, shape index: {}]   ;;  %s1940_s1 = inlined_call_operand.hbm [shape: bf16[128,384], index: 1, kind: input, shape index: {}]   ;;  %s1941_s2 = inlined_call_operand.vmem [shape: f32[1,128], index: 2, kind: input, shape index: {}]   ;;  %s1942_s3 = inlined_call_operand.vmem [shape: f32[1,128], index: 3, kind: input, shape index: {}]   ;;  %s1943_s4 = inlined_call_operand.hbm [shape: bf16[128,384], index: 4, kind: input, shape index: {}]   ;;  %s1944_s5 = inlined_call_operand.vmem [shape: f32[1,128], index: 5, kind: input, shape index: {}]   ;;  %s1945_s6 = inlined_call_operand.vmem [shape: f32[1,128], index: 6, kind: input, shape index: {}]   ;;  %s1946_s7 = inlined_call_operand.vmem [shape: f32[1,128], index: 7, kind: input, shape index: {}]   ;;  %s1947_s8 = inlined_call_operand.<no memory space> [shape: f32[1], index: 8, kind: input, shape index: {}]   ;;  %s1948_s9 = inlined_call_operand.hbm [shape: f32[2,1,2], index: 9, kind: output, shape index: {}]  }
   0x1   :  { %1949 = sst [smem:[#allocation13_spill]] %s1940_s1 }
   0x2   :  { %1950 = sst [smem:[#allocation14_spill]] %s1943_s4 }
   0x3   :  { %14 = sst [smem:[#allocation2]] %s1947_s8 }
   0x4   :  { %15 = vsyncpa [#allocation4], 0 }
   0x5   :  { %17 = vsyncpa [#allocation4 + $0x1], 0 }
   0x6   :  { %18 = vsyncpa [#allocation7], 0 }
   0x7   :  { %19 = vsyncpa [#allocation5], 0 }
   0x8   :  { %21 = vsyncpa [#allocation5 + $0x1], 0  ;;  %s1681_s11 = smov 0   ;;  %s1683_s12 = smov 0  }
   0x9   :  { %s1685_s13 = smov 0   ;;  %s1687_s14 = smov 0  }
   0xa LB: > { %s1702_s8 = sadd.s32 4294967295, %s1620_s14   ;;  %s1101_s15 = sadd.s32 4294967294, %s1620_s14   ;;  %s1620_s14 = sphi %s1687_s14, %s1962_s14   ;;  %s1616_s13 = sphi %s1685_s13, %s1961_s13   ;;  %s1612_s12 = sphi %s1683_s12, %s1960_s12   ;;  %s1608_s11 = sphi %s1681_s11, %s1959_s11  }
   0xb   : > { %p47_p0 = scmp.ne.s32.totalorder %s1612_s12, %s1608_s11  ;;  %p48_p1 = scmp.eq.s32.totalorder %s1702_s8, 0 }
   0xc   : > { %p239_p2 = scmp.eq.s32.totalorder %s1702_s8, 1  ;;  %p245_p3 = scmp.eq.s32.totalorder %s1101_s15, 1 }
   0xd   : > { %p1711_p4 = por %p48_p1, %p47_p0  ;;  %p1102_p5 = scmp.ge.s32.totalorder %s1620_s14, 1 }
   0xe   : > { %p1716_p6 = por %p245_p3, %p47_p0  ;;  %p252_p7 = scmp.lt.s32.totalorder %s1620_s14, 3 }
   0xf   : > { %s1953_s1 = sld [smem:[#allocation13_spill]]  ;;  %s1622_s22 = smov [#allocation6]  }
  0x10   : > { %p1724_p8 = pnand %p1102_p5, %p252_p7  ;;  %s265_s23 = sshll.u32 %s1622_s22, 4  ;;  %s266_s23 = int_to_ptr.vmem [resolvable:$true] %s265_s23 }
  0x11   : > { %s1955_s4 = sld [smem:[#allocation14_spill]]  ;;  %s1623_s27 = smov 192  }
  0x12   : > { %p1396_p9 = pneg %p1724_p8  ;;  %s1624_s28 = smov 12  }
  0x13   : > { %s1625_s29 = smov [#allocation8]   ;;  %s1737_s10 = sadd.s32 1, %s1620_s14  }
  0x14   : > { %p1397_p10 = pnand %p1396_p9, %p48_p1  ;;  %s285_s30 = sshll.u32 %s1625_s29, 4  ;;  %s286_s30 = int_to_ptr.vmem [resolvable:$true] %s285_s30 }
  0x15   : > { %s263_s20 = sshll.u32 %s1953_s1, 4  ;;  %s34_s15 = sadd.s32 1, %s1616_s13  ;;  %s264_s20 = int_to_ptr.hbm [resolvable:$true] %s263_s20 }
  0x16   : > { %1399 = dma.hbm_to_vmem [thread:$0]  (!%p1397_p10), %s264_s20, 3072, %s266_s23, [#allocation7], %s1623_s27, %s1623_s27, %s1624_s28  }
  0x17   : > { %s283_s26 = sshll.u32 %s1955_s4, 4  ;;  %s31_s18 = ssub.s32 %s1620_s14, %s1737_s10  ;;  %s284_s26 = int_to_ptr.hbm [resolvable:$true] %s283_s26 }
  0x18   : > { %1402 = dma.hbm_to_vmem [thread:$0]  (!%p1397_p10), %s284_s26, 3072, %s286_s30, [#allocation7], %s1623_s27, %s1623_s27, %s1624_s28  }
  0x19   : > { %p41_p12 = scmp.ne.s32.totalorder %s1616_s13, %s1612_s12  ;;  %p32_p13 = scmp.eq.s32.totalorder %s31_s18, 0 }
  0x1a   : > { %p42_p0 = scmp.eq.s32.totalorder %s1620_s14, 0  ;;  %p1413_p5 = scmp.lt.s32.totalorder %s1620_s14, 2 }
  0x1b   : > { %p1747_p3 = por %p239_p2, %p41_p12  ;;  %s311_s22 = sand.u32 1, %s1616_s13  }
  0x1c   : > { %s1753_s20 = scalar_select %p32_p13, %s1616_s13, %s34_s15  }
  0x1d   : > { %p43_p7 = por %p42_p0, %p41_p12  ;;  %s1106_s23 = sshll.u32 %s311_s22, 4 }
  0x1e   : > { %s1317_s24 = sshll.u32 %s1620_s14, 4  ;;  %s315_s28 = scalar_lea.vmem [#allocation3], %s1106_s23 }
  0x1f   : > { %s321_s27 = scalar_lea.hbm %s1939_s0, %s1317_s24  ;;  %s324_s29 = sshll.u32 %s315_s28, 4  ;;  %s325_s29 = int_to_ptr.vmem [resolvable:$true] %s324_s29 }
  0x20   : > { %s322_s30 = sshll.u32 %s321_s27, 4  ;;  %p1760_p2 = pnand %p1413_p5, %p43_p7  ;;  %s323_s30 = int_to_ptr.hbm [resolvable:$true] %s322_s30 }
  0x21   : > { %s312_s15 = scalar_lea.sflag [#allocation4], %s311_s22  ;;  %s1520_s1 = sshra.s32 %s323_s30, 4  ;;  %s1521_s1 = int_to_ptr.hbm [resolvable:$true] %s1520_s1 }
  0x22   : > { %s1522_s4 = scalar_lea.hbm %s1521_s1, 16  ;;  %p1524_p10 = pneg %p1760_p2 }
  0x23   : > { %p1523_p9 = scmp.ne.s32.totalorder %s1521_s1, %s1522_s4  ;;  %s1527_s25 = scalar_lea.hbm %s1939_s0, 32 }
  0x24   : > { %p1528_p0 = scmp.lt.s32.totalorder %s1521_s1, %s1939_s0  ;;  %p1529_p5 = scmp.lt.s32.totalorder %s1527_s25, %s1522_s4 }
  0x25   : > { %p1525_p12 = pnand %p1524_p10, %p1523_p9 }
  0x26   : > { %p1530_p7 = por %p1529_p5, %p1528_p0 }
  0x27   : > { %p1526_p13 = pneg %p1525_p12 }
  0x29   : > { %p1531_p11 = pnand %p1530_p7, %p1526_p13 }
  0x2b   : > { %1534 = shalt.err (!%p1531_p11)
}
  0x2c   : > { %s1626_s22 = smov 64   ;;  %s1627_s28 = smov 4  }
  0x2d   : > { %1406 = dma.hbm_to_vmem [thread:$0]  (!%p1760_p2), %s323_s30, 256, %s325_s29, %s312_s15, %s1626_s22, %s1626_s22, %s1627_s28  }
  0x2e   : > { %336 = sbr.rel (%p1724_p8) target bundleno = 583 (0x247), region = 56  ;;  %s1777_s24 = sand.u32 (!%p1724_p8), 1, %s1612_s12  }
  0x2f   : > { %s1111_s23 = sshll.u32 (!%p1724_p8), %s1777_s24, 4  ;;  %s339_s1 = scalar_lea.sflag (!%p1724_p8), [#allocation4], %s1777_s24 }
  0x30   : > { %s1781_s4 = scalar_lea.vmem (!%p1724_p8), [#allocation3], %s1111_s23 }
  0x33   : > { %1595 = dma.done.wait (%p1711_p4), %s339_s1, 256  }
  0x34   : > { %1597 = vsyncadd (%p1711_p4), %s339_s1, 4294967040 }
  0x35   : > { %1599 = dma.done.wait (%p48_p1), [#allocation7], 6144  }
  0x36   : > { %1601 = vsyncadd (%p48_p1), [#allocation7], 4294961152  ;;  %v1208_v0 = vld [vmem:[#allocation6 + $0xa8] sm:$0xf]  ;;  %v1342_v1 = vld [vmem:[#allocation6 + $0xb0] sm:$0xf0] }
  0x37   : > { %v1216_v2 = vld [vmem:[#allocation6 + $0xb0] sm:$0xf]  ;;  %v1209_v3 = vor.u32 %v1342_v1, %v1208_v0  ;;  %v1343_v4 = vld [vmem:[#allocation6 + $0xb8] sm:$0xf0]  ;;  %v1341_v5 = vld [vmem:[#allocation6 + $0xac] sm:$0xf] }
  0x38   : > { %v1210_v6 = vld [vmem:[#allocation6 + $0xb4] sm:$0xf0]  ;;  %v1217_v7 = vor.u32 %v1343_v4, %v1216_v2  ;;  %v1196_v9 = vld [vmem:[#allocation6 + $0x90] sm:$0xf]  ;;  %v1339_v10 = vld [vmem:[#allocation6 + $0x98] sm:$0xf0] }
  0x39   : > { %v1213_v8 = vor.u32 %v1341_v5, %v1210_v6  ;;  %v1204_v11 = vld [vmem:[#allocation6 + $0x98] sm:$0xf]  ;;  %571 = vmatpush.bf16.msra.mxu0 %v1209_v3  ;;  %v1197_v12 = vor.u32 %v1339_v10, %v1196_v9  ;;  %v1340_v13 = vld [vmem:[#allocation6 + $0xa0] sm:$0xf0]  ;;  %v1338_v14 = vld [vmem:[#allocation6 + $0x94] sm:$0xf] }
  0x3a   : > { %v1198_v15 = vld [vmem:[#allocation6 + $0x9c] sm:$0xf0]  ;;  %609 = vmatpush.bf16.msra.mxu2 %v1217_v7  ;;  %v1205_v16 = vor.u32 %v1340_v13, %v1204_v11  ;;  %v1184_v18 = vld [vmem:[#allocation6 + $0x78] sm:$0xf]  ;;  %v1336_v19 = vld [vmem:[#allocation6 + $0x80] sm:$0xf0] }
  0x3b   : > { %590 = vmatpush.bf16.msra.mxu1 %v1213_v8  ;;  %v1201_v17 = vor.u32 %v1338_v14, %v1198_v15  ;;  %v1192_v20 = vld [vmem:[#allocation6 + $0x80] sm:$0xf]  ;;  %v1337_v21 = vld [vmem:[#allocation6 + $0x88] sm:$0xf0]  ;;  %v1335_v22 = vld [vmem:[#allocation6 + $0x7c] sm:$0xf]  ;;  %v1185_v24 = vor.u32 %v1336_v19, %v1184_v18 }
  0x3c   : > { %v1186_v23 = vld [vmem:[#allocation6 + $0x84] sm:$0xf0]  ;;  %v1193_v25 = vor.u32 %v1337_v21, %v1192_v20  ;;  %v1172_v27 = vld [vmem:[#allocation6 + $0x60] sm:$0xf]  ;;  %v1333_v28 = vld [vmem:[#allocation6 + $0x68] sm:$0xf0] }
  0x3d   : > { %572 = vmatpush.bf16.msra.mxu0 %v1197_v12  ;;  %v1189_v26 = vor.u32 %v1335_v22, %v1186_v23  ;;  %v1180_v29 = vld [vmem:[#allocation6 + $0x68] sm:$0xf]  ;;  %v1334_v30 = vld [vmem:[#allocation6 + $0x70] sm:$0xf0]  ;;  %v1332_v31 = vld [vmem:[#allocation6 + $0x64] sm:$0xf]  ;;  %v1173_v33 = vor.u32 %v1333_v28, %v1172_v27 }
  0x3e   : > { %610 = vmatpush.bf16.msra.mxu2 %v1205_v16  ;;  %v1174_v32 = vld [vmem:[#allocation6 + $0x6c] sm:$0xf0]  ;;  %v1181_v34 = vor.u32 %v1334_v30, %v1180_v29  ;;  %v1160_v36 = vld [vmem:[#allocation6 + $0x48] sm:$0xf]  ;;  %v1330_v37 = vld [vmem:[#allocation6 + $0x50] sm:$0xf0] }
  0x3f   : > { %591 = vmatpush.bf16.msra.mxu1 %v1201_v17  ;;  %v1177_v35 = vor.u32 %v1332_v31, %v1174_v32  ;;  %v1168_v38 = vld [vmem:[#allocation6 + $0x50] sm:$0xf]  ;;  %v1331_v39 = vld [vmem:[#allocation6 + $0x58] sm:$0xf0]  ;;  %v1329_v40 = vld [vmem:[#allocation6 + $0x4c] sm:$0xf]  ;;  %v1161_v43 = vor.u32 %v1330_v37, %v1160_v36 }
  0x40   : > { %v1162_v41 = vld [vmem:[#allocation6 + $0x54] sm:$0xf0]  ;;  %v1148_v42 = vld [vmem:[#allocation6 + $0x30] sm:$0xf]  ;;  %v1327_v44 = vld [vmem:[#allocation6 + $0x38] sm:$0xf0]  ;;  %v1169_v47 = vor.u32 %v1331_v39, %v1168_v38 }
  0x41   : > { %573 = vmatpush.bf16.msra.mxu0 %v1185_v24  ;;  %v1156_v45 = vld [vmem:[#allocation6 + $0x38] sm:$0xf]  ;;  %v1328_v46 = vld [vmem:[#allocation6 + $0x40] sm:$0xf0]  ;;  %v1165_v48 = vor.u32 %v1329_v40, %v1162_v41  ;;  %v1326_v49 = vld [vmem:[#allocation6 + $0x34] sm:$0xf]  ;;  %v1149_v51 = vor.u32 %v1327_v44, %v1148_v42 }
  0x42   : > { %611 = vmatpush.bf16.msra.mxu2 %v1193_v25  ;;  %v1150_v50 = vld [vmem:[#allocation6 + $0x3c] sm:$0xf0]  ;;  %v1157_v52 = vor.u32 %v1328_v46, %v1156_v45  ;;  %v1136_v54 = vld [vmem:[#allocation6 + $0x18] sm:$0xf]  ;;  %v1324_v55 = vld [vmem:[#allocation6 + $0x20] sm:$0xf0] }
  0x43   : > { %592 = vmatpush.bf16.msra.mxu1 %v1189_v26  ;;  %v1153_v53 = vor.u32 %v1326_v49, %v1150_v50  ;;  %v1144_v56 = vld [vmem:[#allocation6 + $0x20] sm:$0xf]  ;;  %v1325_v57 = vld [vmem:[#allocation6 + $0x28] sm:$0xf0]  ;;  %v1323_v58 = vld [vmem:[#allocation6 + $0x1c] sm:$0xf]  ;;  %v1137_v60 = vor.u32 %v1324_v55, %v1136_v54 }
  0x44   : > { %v1138_v59 = vld [vmem:[#allocation6 + $0x24] sm:$0xf0]  ;;  %v1145_v61 = vor.u32 %v1325_v57, %v1144_v56  ;;  %v1124_v63 = vld [vmem:[#allocation6] sm:$0xf]  ;;  %v1321_v0 = vld [vmem:[#allocation6 + $0x8] sm:$0xf0] }
  0x45   : > { %574 = vmatpush.bf16.msra.mxu0 %v1173_v33  ;;  %v1141_v62 = vor.u32 %v1323_v58, %v1138_v59  ;;  %v1132_v1 = vld [vmem:[#allocation6 + $0x8] sm:$0xf]  ;;  %v1322_v2 = vld [vmem:[#allocation6 + $0x10] sm:$0xf0]  ;;  %v1320_v3 = vld [vmem:[#allocation6 + $0x4] sm:$0xf]  ;;  %v1125_v5 = vor.u32 %v1321_v0, %v1124_v63 }
  0x46   : > { %612 = vmatpush.bf16.msra.mxu2 %v1181_v34  ;;  %v1126_v4 = vld [vmem:[#allocation6 + $0xc] sm:$0xf0]  ;;  %v1133_v6 = vor.u32 %v1322_v2, %v1132_v1  ;;  %v1319_v9 = vld [vmem:[%s1781_s4 + $0x8] sm:$0xff]  ;;  %v1366_v11 = vld [vmem:[#allocation8 + $0xb0] sm:$0xf0]  ;;  %vm986_vm4 = vcmask 1041409  }
  0x47   : > { %593 = vmatpush.bf16.msra.mxu1 %v1177_v35  ;;  %v1129_v7 = vor.u32 %v1320_v3, %v1126_v4  ;;  %v1318_v8 = vld [vmem:[%s1781_s4] sm:$0xff]  ;;  %v1304_v10 = vld [vmem:[#allocation8 + $0xa8] sm:$0xf]  ;;  %v1365_v12 = vld [vmem:[#allocation8 + $0xac] sm:$0xf]  ;;  %vm989_vm5 = vcmask 1041408   ;;  %s1012_s4 = scalar_lea.hbm %s1948_s9, %s1702_s8 }
  0x48   : > { %v1305_v13 = vor.u32 %v1366_v11, %v1304_v10  ;;  %v1306_v14 = vld [vmem:[#allocation8 + $0xb4] sm:$0xf0]  ;;  %v1312_v15 = vld [vmem:[#allocation8 + $0xb0] sm:$0xf]  ;;  %v1367_v16 = vld [vmem:[#allocation8 + $0xb8] sm:$0xf0] }
  0x49   : > { %575 = vmatpush.bf16.msra.mxu0 %v1161_v43  ;;  %v1309_v17 = vor.u32 %v1365_v12, %v1306_v14  ;;  %v1793_v18 = vor.u32 %v1367_v16, %v1312_v15  ;;  %v1292_v19 = vld [vmem:[#allocation8 + $0x90] sm:$0xf]  ;;  %v1363_v20 = vld [vmem:[#allocation8 + $0x98] sm:$0xf0]  ;;  %v1362_v22 = vld [vmem:[#allocation8 + $0x94] sm:$0xf] }
  0x4a   : > { %613 = vmatpush.bf16.msra.mxu2 %v1169_v47  ;;  %852 = vmatpush.bf16.msra.mxu3 %v1305_v13  ;;  %v1293_v21 = vor.u32 %v1363_v20, %v1292_v19  ;;  %v1294_v23 = vld [vmem:[#allocation8 + $0x9c] sm:$0xf0]  ;;  %v1300_v24 = vld [vmem:[#allocation8 + $0x98] sm:$0xf]  ;;  %v1364_v26 = vld [vmem:[#allocation8 + $0xa0] sm:$0xf0] }
  0x4b   : > { %594 = vmatpush.bf16.msra.mxu1 %v1165_v48  ;;  %v1297_v25 = vor.u32 %v1362_v22, %v1294_v23  ;;  %v1796_v27 = vor.u32 %v1364_v26, %v1300_v24  ;;  %v1280_v28 = vld [vmem:[#allocation8 + $0x78] sm:$0xf]  ;;  %v1360_v29 = vld [vmem:[#allocation8 + $0x80] sm:$0xf0]  ;;  %v1359_v31 = vld [vmem:[#allocation8 + $0x7c] sm:$0xf]  ;;  %v388_v24 = vlaneseq }
  0x4c   : > { %v1281_v30 = vor.u32 %v1360_v29, %v1280_v28  ;;  %v1282_v32 = vld [vmem:[#allocation8 + $0x84] sm:$0xf0]  ;;  %v1288_v33 = vld [vmem:[#allocation8 + $0x80] sm:$0xf]  ;;  %v1361_v35 = vld [vmem:[#allocation8 + $0x88] sm:$0xf0] }
  0x4d   : > { %576 = vmatpush.bf16.msra.mxu0 %v1149_v51  ;;  %v1285_v34 = vor.u32 %v1359_v31, %v1282_v32  ;;  %v1799_v36 = vor.u32 %v1361_v35, %v1288_v33  ;;  %v1268_v37 = vld [vmem:[#allocation8 + $0x60] sm:$0xf]  ;;  %v1357_v38 = vld [vmem:[#allocation8 + $0x68] sm:$0xf0]  ;;  %v1356_v39 = vld [vmem:[#allocation8 + $0x64] sm:$0xf] }
  0x4e   : > { %614 = vmatpush.bf16.msra.mxu2 %v1157_v52  ;;  %853 = vmatpush.bf16.msra.mxu3 %v1293_v21  ;;  %v1269_v40 = vor.u32 %v1357_v38, %v1268_v37  ;;  %v1270_v41 = vld [vmem:[#allocation8 + $0x6c] sm:$0xf0]  ;;  %v1276_v42 = vld [vmem:[#allocation8 + $0x68] sm:$0xf]  ;;  %v1358_v44 = vld [vmem:[#allocation8 + $0x70] sm:$0xf0] }
  0x4f   : > { %595 = vmatpush.bf16.msra.mxu1 %v1153_v53  ;;  %v1273_v43 = vor.u32 %v1356_v39, %v1270_v41  ;;  %v1802_v45 = vor.u32 %v1358_v44, %v1276_v42  ;;  %v1256_v46 = vld [vmem:[#allocation8 + $0x48] sm:$0xf]  ;;  %v1354_v47 = vld [vmem:[#allocation8 + $0x50] sm:$0xf0]  ;;  %v1353_v48 = vld [vmem:[#allocation8 + $0x4c] sm:$0xf] }
  0x50   : > { %v1257_v49 = vor.u32 %v1354_v47, %v1256_v46  ;;  %v1258_v50 = vld [vmem:[#allocation8 + $0x54] sm:$0xf0]  ;;  %v1264_v51 = vld [vmem:[#allocation8 + $0x50] sm:$0xf]  ;;  %v1355_v52 = vld [vmem:[#allocation8 + $0x58] sm:$0xf0] }
  0x51   : > { %577 = vmatpush.bf16.msra.mxu0 %v1137_v60  ;;  %v1261_v53 = vor.u32 %v1353_v48, %v1258_v50  ;;  %v1805_v54 = vor.u32 %v1355_v52, %v1264_v51  ;;  %v1244_v55 = vld [vmem:[#allocation8 + $0x30] sm:$0xf]  ;;  %v1351_v56 = vld [vmem:[#allocation8 + $0x38] sm:$0xf0]  ;;  %v1350_v58 = vld [vmem:[#allocation8 + $0x34] sm:$0xf] }
  0x52   : > { %615 = vmatpush.bf16.msra.mxu2 %v1145_v61  ;;  %854 = vmatpush.bf16.msra.mxu3 %v1281_v30  ;;  %v1245_v57 = vor.u32 %v1351_v56, %v1244_v55  ;;  %v1246_v59 = vld [vmem:[#allocation8 + $0x3c] sm:$0xf0]  ;;  %v1252_v60 = vld [vmem:[#allocation8 + $0x38] sm:$0xf]  ;;  %v1348_v2 = vld [vmem:[#allocation8 + $0x20] sm:$0xf0] }
  0x53   : > { %596 = vmatpush.bf16.msra.mxu1 %v1141_v62  ;;  %v1249_v61 = vor.u32 %v1350_v58, %v1246_v59  ;;  %v1352_v62 = vld [vmem:[#allocation8 + $0x40] sm:$0xf0]  ;;  %v1232_v1 = vld [vmem:[#allocation8 + $0x18] sm:$0xf]  ;;  %v1347_v3 = vld [vmem:[#allocation8 + $0x1c] sm:$0xf] }
  0x54   : > { %v1808_v63 = vor.u32 %v1352_v62, %v1252_v60  ;;  %v1220_v11 = vld [vmem:[#allocation8] sm:$0xf]  ;;  %v1345_v12 = vld [vmem:[#allocation8 + $0x8] sm:$0xf0]  ;;  %v1344_v13 = vld [vmem:[#allocation8 + $0x4] sm:$0xf] }
  0x55   : > { %578 = vmatpush.bf16.msra.mxu0 %v1125_v5  ;;  %v1233_v5 = vor.u32 %v1348_v2, %v1232_v1  ;;  %v1221_v14 = vor.u32 %v1345_v12, %v1220_v11  ;;  %v1222_v15 = vld [vmem:[#allocation8 + $0xc] sm:$0xf0]  ;;  %v1228_v16 = vld [vmem:[#allocation8 + $0x8] sm:$0xf]  ;;  %v1824_v26 = vshrl.u32 %v388_v24, 7  ;;  %s993_s28 = sld [smem:[#allocation2]] }
  0x56   : > { %616 = vmatpush.bf16.msra.mxu2 %v1133_v6  ;;  %855 = vmatpush.bf16.msra.mxu3 %v1269_v40  ;;  %v1234_v6 = vld [vmem:[#allocation8 + $0x24] sm:$0xf0]  ;;  %v1225_v19 = vor.u32 %v1344_v13, %v1222_v15  ;;  %v1455_v40 = vld [vmem:[%s1941_s2] ss:$0 sm:$0xff]  ;;  %s386_s16 = scalar_lea.vmem [#allocation9], %s1777_s24  ;;  %s1016_s29 = sshll.u32 %s1012_s4, 4  ;;  %s1017_s29 = int_to_ptr.hbm [resolvable:$true] %s1016_s29 }
  0x57   : > { %597 = vmatpush.bf16.msra.mxu1 %v1129_v7  ;;  %v1240_v7 = vld [vmem:[#allocation8 + $0x20] sm:$0xf]  ;;  %vm632_vm0 = vcmp.lt.s32.totalorder %v1824_v26, 1  ;;  %v1829_v30 = vadd.s32 8, %v1824_v26  ;;  %vm653_vm2 = vcmp.lt.s32.totalorder %v1824_v26, 7  ;;  %vm391_vm3 = vcmp.ne.s32.totalorder %v1824_v26, 0 }
  0x58   : > { %579 = vmatmul.bf16.vlgmr.msra.gmra.mxu0 %v1318_v8  ;;  %v1456_v48 = vld [vmem:[%s1942_s3] ss:$0 sm:$0xff]  ;;  %s1014_s21 = sshll.u32 %s386_s16, 4  ;;  %vm1001_vm6 = vcmask 8192   ;;  %s1004_s30 = scalar_lea.sflag [#allocation5], %s1777_s24  ;;  %s1015_s21 = int_to_ptr.vmem [resolvable:$true] %s1014_s21 }
  0x59   : > { %617 = vmatmul.bf16.vlgmr.msra.gmra.mxu2 %v1318_v8  ;;  %871 = vmatpush.bf16.msrb.mxu0 %v1309_v17  ;;  %vm394_vm1 = vcmp.ne.s32.totalorder %v1829_v30, 15  ;;  %s1564_s18 = sshra.s32 %s1017_s29, 4  ;;  %s1570_s26 = scalar_lea.hbm %s1948_s9, 2  ;;  %s1565_s18 = int_to_ptr.hbm [resolvable:$true] %s1564_s18 }
  0x5a   : > { %598 = vmatmul.bf16.vlgmr.msra.gmra.mxu1 %v1318_v8  ;;  %1368 = vmatpush.bf16.msrb.mxu2 %v1309_v17  ;;  %v1237_v8 = vor.u32 %v1347_v3, %v1234_v6  ;;  %v1346_v17 = vld [vmem:[#allocation8 + $0x10] sm:$0xf0]  ;;  %s1566_s15 = scalar_lea.hbm %s1565_s18, 1  ;;  %p1571_p11 = scmp.lt.s32.totalorder %s1565_s18, %s1948_s9 }
  0x5b   : > { %890 = vmatpush.bf16.msrb.mxu1 %v1793_v18  ;;  %856 = vmatpush.bf16.msra.mxu3 %v1257_v49  ;;  %v1818_v20 = vor.u32 %v1346_v17, %v1228_v16  ;;  %p1567_p1 = scmp.ne.s32.totalorder %s1565_s18, %s1566_s15  ;;  %p1572_p2 = scmp.lt.s32.totalorder %s1570_s26, %s1566_s15 }
  0x5d   : > { %872 = vmatpush.bf16.msrb.mxu0 %v1297_v25  ;;  %p1568_p4 = pnand %p1567_p1, %p1747_p3  ;;  %p1573_p9 = por %p1572_p2, %p1571_p11 }
  0x5e   : > { %1369 = vmatpush.bf16.msrb.mxu2 %v1297_v25 }
  0x5f   : > { %891 = vmatpush.bf16.msrb.mxu1 %v1796_v27  ;;  %857 = vmatpush.bf16.msra.mxu3 %v1245_v57  ;;  %p1569_p8 = pneg %p1568_p4 }
  0x61   : > { %873 = vmatpush.bf16.msrb.mxu0 %v1285_v34  ;;  %p1574_p10 = pnand %p1573_p9, %p1569_p8 }
  0x62   : > { %1370 = vmatpush.bf16.msrb.mxu2 %v1285_v34 }
  0x63   : > { %892 = vmatpush.bf16.msrb.mxu1 %v1799_v36  ;;  %858 = vmatpush.bf16.msra.mxu3 %v1233_v5 }
  0x65   : > { %874 = vmatpush.bf16.msrb.mxu0 %v1273_v43 }
  0x66   : > { %1371 = vmatpush.bf16.msrb.mxu2 %v1273_v43 }
  0x67   : > { %893 = vmatpush.bf16.msrb.mxu1 %v1802_v45  ;;  %859 = vmatpush.bf16.msra.mxu3 %v1221_v14 }
  0x68   : > { %584 = vmatmul.bf16.gmra.mxu0 %v1319_v9 }
  0x69   : > { %622 = vmatmul.bf16.gmra.mxu2 %v1319_v9  ;;  %875 = vmatpush.bf16.msrb.mxu0 %v1261_v53 }
  0x6a   : > { %603 = vmatmul.bf16.gmra.mxu1 %v1319_v9  ;;  %1372 = vmatpush.bf16.msrb.mxu2 %v1261_v53  ;;  %v1349_v9 = vld [vmem:[#allocation8 + $0x28] sm:$0xf0] }
  0x6b   : > { %894 = vmatpush.bf16.msrb.mxu1 %v1805_v54  ;;  %v1815_v10 = vor.u32 %v1349_v9, %v1240_v7  ;;  %1376 = vmatpush.bf16.msrb.mxu3 %v1793_v18 }
  0x6d   : > { %876 = vmatpush.bf16.msrb.mxu0 %v1249_v61 }
  0x6e   : > { %1373 = vmatpush.bf16.msrb.mxu2 %v1249_v61 }
  0x6f   : > { %895 = vmatpush.bf16.msrb.mxu1 %v1808_v63  ;;  %1377 = vmatpush.bf16.msrb.mxu3 %v1796_v27 }
  0x71   : > { %877 = vmatpush.bf16.msrb.mxu0 %v1237_v8 }
  0x72   : > { %1374 = vmatpush.bf16.msrb.mxu2 %v1237_v8 }
  0x73   : > { %896 = vmatpush.bf16.msrb.mxu1 %v1815_v10  ;;  %1378 = vmatpush.bf16.msrb.mxu3 %v1799_v36 }
  0x75   : > { %878 = vmatpush.bf16.msrb.mxu0 %v1225_v19 }
  0x76   : > { %1375 = vmatpush.bf16.msrb.mxu2 %v1225_v19 }
  0x77   : > { %897 = vmatpush.bf16.msrb.mxu1 %v1818_v20  ;;  %1379 = vmatpush.bf16.msrb.mxu3 %v1802_v45 }
  0x7b   : > { %1380 = vmatpush.bf16.msrb.mxu3 %v1805_v54 }
  0x7f   : > { %1381 = vmatpush.bf16.msrb.mxu3 %v1808_v63 }
  0x83   : > { %1382 = vmatpush.bf16.msrb.mxu3 %v1815_v10 }
  0x87   : > { %1383 = vmatpush.bf16.msrb.mxu3 %v1818_v20 }
  0xd5   : > { %v1810_v0 = vpop.f32.mrf.mxu0 }
  0xd6   : > { %v628_v18 = vrot.slane %v1810_v0, 7 }
  0xd7   : > { %v1812_v4 = vpop.f32.mrf.mxu1 }
  0xdc   : > { %v618_v21 = vpop.f32.mrf.mxu2 }
  0xdd   : > { %v582_v22 = vpop.f32.mrf.mxu0  ;;  %v649_v44 = vrot.slane %v618_v21, 1 }
  0xde   : > { %v629_v29 = vrot.slane %v582_v22, 7 }
  0xdf   : > { %v601_v23 = vpop.f32.mrf.mxu1 }
  0xe0   : > { %v635_v27 = vsel %vm632_vm0, %v628_v18, %v629_v29 }
  0xe1   : > { %v646_v38 = vadd.f32 %v635_v27, %v601_v23 }
  0xe4   : > { %v620_v25 = vpop.f32.mrf.mxu2 }
  0xe5   : > { %v585_v28 = vpop.f32.mrf.mxu0  ;;  %v650_v34 = vrot.slane %v620_v25, 1 }
  0xe6   : > { %v630_v32 = vrot.slane %v585_v28, 7 }
  0xe7   : > { %v604_v31 = vpop.f32.mrf.mxu1  ;;  %v656_v49 = vsel %vm653_vm2, %v649_v44, %v650_v34 }
  0xe8   : > { %v634_v41 = vsel %vm632_vm0, %v629_v29, %v630_v32 }
  0xe9   : > { %v643_v50 = vsel %vm391_vm3, %v634_v41, 0.0 }
  0xea   : > { %v647_v57 = vadd.f32 %v643_v50, %v604_v31 }
  0xec   : > { %v623_v33 = vpop.f32.mrf.mxu2 }
  0xed   : > { %v651_v35 = vrot.slane %v623_v33, 1  ;;  %v587_v36 = vpop.f32.mrf.mxu0 }
  0xee   : > { %v631_v37 = vrot.slane %v587_v36, 7 }
  0xef   : > { %v655_v39 = vsel %vm653_vm2, %v650_v34, %v651_v35  ;;  %v606_v53 = vpop.f32.mrf.mxu1  ;;  %v1457_v34 = vld [vmem:[%s1944_s5] ss:$0 sm:$0xff] }
  0xf0   : > { %v663_v42 = vsel %vm394_vm1, %v655_v39, 0.0  ;;  %v636_v43 = vsel %vm632_vm0, %v631_v37, %v628_v18  ;;  %v633_v54 = vsel %vm632_vm0, %v630_v32, %v631_v37 }
  0xf1   : > { %v667_v45 = vadd.f32 %v663_v42, %v646_v38  ;;  %v641_v46 = vsel %vm391_vm3, %v636_v43, 0.0  ;;  %v648_v60 = vadd.f32 %v633_v54, %v606_v53  ;;  %v1458_v42 = vld [vmem:[%s1945_s6] ss:$0 sm:$0xff] }
  0xf2   : > { %v645_v47 = vadd.f32 %v641_v46, %v1812_v4 }
  0xf3   : > { %v675_v51 = vmul.f32 %v1455_v40, %v667_v45 }
  0xf4   : > { %v666_v52 = vadd.f32 %v656_v49, %v645_v47  ;;  %v625_v55 = vpop.f32.mrf.mxu2 }
  0xf5   : > { %v652_v56 = vrot.slane %v625_v55, 1  ;;  %v683_v59 = vadd.f32 %v1456_v48, %v675_v51 }
  0xf6   : > { %v674_v58 = vmul.f32 %v1455_v40, %v666_v52 }
  0xf7   : > { %v654_v61 = vsel %vm653_vm2, %v651_v35, %v652_v56  ;;  %v657_v62 = vsel %vm653_vm2, %v652_v56, %v649_v44  ;;  %v687_v5 = vmax.f32 %v683_v59, 0.0 }
  0xf8   : > { %v665_v63 = vsel %vm394_vm1, %v657_v62, 0.0  ;;  %v668_v0 = vadd.f32 %v654_v61, %v647_v57  ;;  %v682_v1 = vadd.f32 %v1456_v48, %v674_v58 }
  0xf9   : > { %v669_v2 = vadd.f32 %v665_v63, %v648_v60 }
  0xfa   : > { %v676_v3 = vmul.f32 %v1455_v40, %v668_v0  ;;  %v686_v4 = vmax.f32 %v682_v1, 0.0 }
  0xfb   : > { %v677_v6 = vmul.f32 %v1455_v40, %v669_v2 }
  0xfc   : > { %v690_v7 = vpack.c.bf16 %v687_v5, %v686_v4  ;;  %v684_v8 = vadd.f32 %v1456_v48, %v676_v3 }
  0xfd   : > { %v685_v9 = vadd.f32 %v1456_v48, %v677_v6 }
  0xfe   : > { %860 = vmatmul.bf16.vlgmr.msra.gmra.mxu3 %v690_v7  ;;  %879 = vmatmul.bf16.vlgmr.msrb.gmra.mxu0 %v690_v7  ;;  %v688_v10 = vmax.f32 %v684_v8, 0.0 }
  0xff   : > { %898 = vmatmul.bf16.vlgmr.msrb.gmra.mxu1 %v690_v7  ;;  %v689_v11 = vmax.f32 %v685_v9, 0.0 }
 0x101   : > { %v691_v12 = vpack.c.bf16 %v689_v11, %v688_v10 }
 0x103   : > { %884 = vmatmul.bf16.vlgmr.msrb.gmra.mxu2 %v691_v12 }
 0x10e   : > { %865 = vmatmul.bf16.gmra.mxu3 %v691_v12 }
 0x11e   : > { %903 = vmatmul.bf16.vlgmr.msrb.gmra.mxu3 %v691_v12 }
 0x17b   : > { %v880_v19 = vpop.f32.mrf.mxu0 }
 0x17c   : > { %v899_v15 = vpop.f32.mrf.mxu1 }
 0x17d   : > { %v925_v28 = vrot.slane %v899_v15, 1 }
 0x181   : > { %v861_v13 = vpop.f32.mrf.mxu3 }
 0x182   : > { %v909_v21 = vrot.slane %v861_v13, 7 }
 0x183   : > { %v882_v39 = vpop.f32.mrf.mxu0 }
 0x184   : > { %v901_v17 = vpop.f32.mrf.mxu1 }
 0x185   : > { %v926_v23 = vrot.slane %v901_v17, 1 }
 0x186   : > { %v885_v32 = vpop.f32.mrf.mxu2 }
 0x187   : > { %v931_v27 = vsel %vm653_vm2, %v925_v28, %v926_v23 }
 0x189   : > { %v863_v14 = vpop.f32.mrf.mxu3 }
 0x18a   : > { %v910_v29 = vrot.slane %v863_v14, 7 }
 0x18c   : > { %v915_v35 = vsel %vm632_vm0, %v909_v21, %v910_v29 }
 0x18d   : > { %v922_v40 = vadd.f32 %v915_v35, %v882_v39 }
 0x18e   : > { %v887_v52 = vpop.f32.mrf.mxu2 }
 0x191   : > { %v866_v16 = vpop.f32.mrf.mxu3 }
 0x192   : > { %v911_v36 = vrot.slane %v866_v16, 7 }
 0x194   : > { %v914_v44 = vsel %vm632_vm0, %v910_v29, %v911_v36 }
 0x195   : > { %v919_v47 = vsel %vm391_vm3, %v914_v44, 0.0 }
 0x196   : > { %v923_v55 = vadd.f32 %v919_v47, %v885_v32 }
 0x199   : > { %v868_v20 = vpop.f32.mrf.mxu3 }
 0x19a   : > { %v912_v22 = vrot.slane %v868_v20, 7 }
 0x19c   : > { %v916_v25 = vsel %vm632_vm0, %v912_v22, %v909_v21  ;;  %v913_v48 = vsel %vm632_vm0, %v911_v36, %v912_v22  ;;  %v1459_v21 = vld [vmem:[%s1946_s7] ss:$0 sm:$0xff] }
 0x19d   : > { %v917_v18 = vsel %vm391_vm3, %v916_v25, 0.0  ;;  %v924_v56 = vadd.f32 %v913_v48, %v887_v52 }
 0x19e   : > { %v921_v31 = vadd.f32 %v917_v18, %v880_v19  ;;  %v994_v18 = vstv %s993_s28 }
 0x1a0   : > { %v937_v33 = vadd.f32 %v931_v27, %v921_v31  ;;  %v998_v31 = vand.u32 127, %v388_v24 }
 0x1a1   : > { %v904_v37 = vpop.f32.mrf.mxu3 }
 0x1a2   : > { %v927_v38 = vrot.slane %v904_v37, 1  ;;  %v945_v41 = vmul.f32 %v1457_v34, %v937_v33 }
 0x1a4   : > { %v930_v43 = vsel %vm653_vm2, %v926_v23, %v927_v38  ;;  %v953_v49 = vadd.f32 %v1458_v42, %v945_v41 }
 0x1a5   : > { %v934_v45 = vsel %vm394_vm1, %v930_v43, 0.0 }
 0x1a6   : > { %v938_v46 = vadd.f32 %v934_v45, %v922_v40  ;;  %v957_v57 = vmax.f32 %v953_v49, 0.0 }
 0x1a8   : > { %v946_v50 = vmul.f32 %v1457_v34, %v938_v46 }
 0x1a9   : > { %v906_v51 = vpop.f32.mrf.mxu3 }
 0x1aa   : > { %v954_v53 = vadd.f32 %v1458_v42, %v946_v50  ;;  %v928_v54 = vrot.slane %v906_v51, 1 }
 0x1ac   : > { %v958_v58 = vmax.f32 %v954_v53, 0.0  ;;  %v929_v59 = vsel %vm653_vm2, %v927_v38, %v928_v54  ;;  %v932_v60 = vsel %vm653_vm2, %v928_v54, %v925_v28 }
 0x1ad   : > { %v936_v61 = vsel %vm394_vm1, %v932_v60, 0.0  ;;  %v939_v62 = vadd.f32 %v929_v59, %v923_v55 }
 0x1ae   : > { %v961_v63 = vadd.f32 %v958_v58, %v957_v57  ;;  %v940_v0 = vadd.f32 %v936_v61, %v924_v56 }
 0x1af   : > { %v947_v1 = vmul.f32 %v1457_v34, %v939_v62 }
 0x1b0   : > { %v948_v2 = vmul.f32 %v1457_v34, %v940_v0  ;;  %v962_v3 = vrot.slane %v961_v63, 4 }
 0x1b1   : > { %v955_v4 = vadd.f32 %v1458_v42, %v947_v1 }
 0x1b2   : > { %v956_v5 = vadd.f32 %v1458_v42, %v948_v2  ;;  %v963_v6 = vadd.f32 %v962_v3, %v961_v63 }
 0x1b3   : > { %v959_v7 = vmax.f32 %v955_v4, 0.0 }
 0x1b4   : > { %v960_v8 = vmax.f32 %v956_v5, 0.0  ;;  %v964_v9 = vrot.slane %v963_v6, 2 }
 0x1b6   : > { %v968_v10 = vadd.f32 %v960_v8, %v959_v7  ;;  %v965_v12 = vadd.f32 %v964_v9, %v963_v6 }
 0x1b8   : > { %v969_v11 = vrot.slane %v968_v10, 4  ;;  %v966_v13 = vrot.slane %v965_v12, 1 }
 0x1ba   : > { %v970_v26 = vadd.f32 %v969_v11, %v968_v10  ;;  %v967_v15 = vadd.f32 %v966_v13, %v965_v12 }
 0x1bc   : > { %v971_v14 = vrot.slane %v970_v26, 2  ;;  %v975_v19 = vmul.f32 0.0625, %v967_v15 }
 0x1be   : > { %v972_v30 = vadd.f32 %v971_v14, %v970_v26  ;;  %v981_v23 = vmul.f32 %v1459_v21, %v975_v19 }
 0x1c0   : > { %v973_v16 = vrot.slane %v972_v30, 1 }
 0x1c2   : > { %v974_v17 = vadd.f32 %v973_v16, %v972_v30 }
 0x1c4   : > { %v976_v20 = vmul.f32 0.0625, %v974_v17 }
 0x1c6   : > { %v982_v22 = vmul.f32 %v1459_v21, %v976_v20 }
 0x1c8   : > { %v985_v25 = vrot.slane %v982_v22, 7 }
 0x1ca   : > { %v987_v28 = vsel %vm986_vm4, %v985_v25, %v981_v23 }
 0x1cb   : > { %v990_v29 = vsel %vm989_vm5, %v987_v28, 0.0 }
 0x1cc   : > { %991 = vadd.xlane.f32.xlu0 %v990_v29 }
 0x23f   : > { %v992_v27 = vpop.xlane.xlu0 %991 }
 0x240   : > { %v995_v32 = vadd.f32 %v994_v18, %v992_v27 }
 0x242   : > { %v999_v33 = vperm.slane %v995_v32, %v998_v31 }
 0x244   : > { %1002 = vst.msk [vmem:[%s386_s16] sm:$0x1] %vm1001_vm6, %v999_v33 }
 0x245   : > { %1577 = shalt.err (!%p1574_p10)
}
 0x246   : > { %1394 = dma.vmem_to_hbm [thread:$0]  (%p1747_p3), %s1015_s21, 16, %s1017_s29, %s1004_s30  }
 0x247 PF: > { %s1028_s24 = sand.u32 1, %s1608_s11   ;;  %p1958_p12 = scmp.ge.s32.totalorder %s1620_s14, 2 }
 0x248   : > { %s1029_s28 = scalar_lea.sflag [#allocation5], %s1028_s24 }
 0x249   : > { %p1408_p13 = pnand %p1958_p12, %p1716_p6 }
 0x24b   : > { %p1409_p0 = pneg %p1408_p13 }
 0x24d   : > { %1603 = dma.done.wait (%p1409_p0), %s1029_s28, 16  }
 0x24e   : > { %1605 = vsyncadd (%p1409_p0), %s1029_s28, 4294967280  ;;  %p24_p5 = scmp.ge.s32.totalorder %s1737_s10, 4   ;;  %s1959_s11 = smov %s1612_s12 }
 0x24f   : > { %s1960_s12 = smov %s1616_s13  ;;  %s1961_s13 = smov %s1753_s20 }
 0x250   : > { %s1962_s14 = smov %s1737_s10  ;;  %26 = sbr.rel (!%p24_p5) target bundleno = 10 (0xa), region = 109 }
 0x255   :  { %1034 = vsyncpa [#allocation4], 1 }
 0x256   :  { %1036 = vsyncpa [#allocation4 + $0x1], 1 }
 0x257   :  { %1037 = vsyncpa [#allocation7], 1 }
 0x258   :  { %1038 = vsyncpa [#allocation5], 1 }
 0x259   :  { %1040 = vsyncpa [#allocation5 + $0x1], 1 }

</bundles_post_ra>
